<compile_context>
chip_gen: v6e
topology: v6e:2x2x1
jax: 0.10.0
libtpu: 0.0.40
codegen_flags: <defaults>
</compile_context>

<pallas_src>
import math
import functools

import jax
import jax.numpy as jnp
from jax import lax
from jax.experimental import pallas as pl
from jax.experimental.pallas import tpu as pltpu


# ----------------------------------------------------------------------------
# Fused encoder-stack kernel: grid = (batch, layer); x resident in VMEM scratch.
# ----------------------------------------------------------------------------
def _encoder_stack_kernel(num_heads, eps,
                          x_ref,
                          wqkv_ref, bqkv_ref, wo_ref, bo_ref,
                          w1_ref, b1_ref, w2_ref, b2_ref,
                          g1_ref, be1_ref, g2_ref, be2_ref,
                          o_ref, xs_ref):
    l = pl.program_id(1)
    num_layers = pl.num_programs(1)

    # Load this batch element's activations once (layer 0), then keep in VMEM.
    @pl.when(l == 0)
    def _():
        xs_ref[...] = x_ref[0].astype(jnp.float32)

    x = xs_ref[...]                                   # (S, E) f32
    S, E = x.shape
    H = num_heads
    Dh = E // H
    scale = 1.0 / math.sqrt(Dh)

    # ---- fused QKV projection: one (S,E)@(E,3E) MXU pass, bias added once ----
    qkv = jnp.dot(x, wqkv_ref[0],
                  preferred_element_type=jnp.float32) + bqkv_ref[0]   # (S, 3E)

    # ---- multi-head self-attention; output projection fused into head loop ----
    attn = None
    for h in range(H):
        lo = h * Dh
        qh = qkv[:, lo:lo + Dh] * scale               # (S, Dh)
        kh = qkv[:, E + lo:E + lo + Dh]               # (S, Dh)
        vh = qkv[:, 2 * E + lo:2 * E + lo + Dh]       # (S, Dh)
        # q @ k.T without an explicit transpose (contract last dims).
        s = lax.dot_general(qh, kh, (((1,), (1,)), ((), ())),
                            preferred_element_type=jnp.float32)       # (S, S)
        s = s - jnp.max(s, axis=-1, keepdims=True)
        p = jnp.exp(s)
        p = p / jnp.sum(p, axis=-1, keepdims=True)
        ctx = jnp.dot(p, vh, preferred_element_type=jnp.float32)      # (S, Dh)
        contrib = jnp.dot(ctx, wo_ref[0, lo:lo + Dh, :],
                          preferred_element_type=jnp.float32)         # (S, E)
        attn = contrib if attn is None else attn + contrib
    attn = attn + bo_ref[0]

    def layer_norm(a, g, b):
        mu = jnp.mean(a, axis=-1, keepdims=True)
        d = a - mu
        var = jnp.mean(d * d, axis=-1, keepdims=True)
        return d * lax.rsqrt(var + eps) * g + b

    # --- post-norm residual blocks (norm_first=False default) ---
    x = layer_norm(x + attn, g1_ref[0], be1_ref[0])

    h1 = jnp.dot(x, w1_ref[0], preferred_element_type=jnp.float32) + b1_ref[0]
    h1 = jnp.maximum(h1, 0.0)                                          # ReLU
    ff = jnp.dot(h1, w2_ref[0], preferred_element_type=jnp.float32) + b2_ref[0]
    x = layer_norm(x + ff, g2_ref[0], be2_ref[0])

    xs_ref[...] = x                                    # stays resident for layer l+1

    @pl.when(l == num_layers - 1)
    def _():
        o_ref[0] = x.astype(o_ref.dtype)


def encoder_stack_pallas(x_bse, packed, num_heads):
    """x_bse: (B, S, E) activations; packed: 12 arrays stacked over layers."""
    B, S, E = x_bse.shape
    (wqkv, bqkv, wo, bo, w1, b1, w2, b2, g1, be1, g2, be2) = packed
    L = wqkv.shape[0]
    F = w1.shape[-1]

    x_map = lambda b, l: (b, 0, 0)
    w_map = lambda b, l: (l, 0, 0)

    w_specs = [
        pl.BlockSpec((1, E, 3 * E), w_map),   # wqkv (pre-transposed, q|k|v fused)
        pl.BlockSpec((1, 1, 3 * E), w_map),   # bqkv
        pl.BlockSpec((1, E, E), w_map),       # wo   (pre-transposed)
        pl.BlockSpec((1, 1, E), w_map),       # bo
        pl.BlockSpec((1, E, F), w_map),       # w1   (pre-transposed)
        pl.BlockSpec((1, 1, F), w_map),       # b1
        pl.BlockSpec((1, F, E), w_map),       # w2   (pre-transposed)
        pl.BlockSpec((1, 1, E), w_map),       # b2
        pl.BlockSpec((1, 1, E), w_map),       # ln1 gamma
        pl.BlockSpec((1, 1, E), w_map),       # ln1 beta
        pl.BlockSpec((1, 1, E), w_map),       # ln2 gamma
        pl.BlockSpec((1, 1, E), w_map),       # ln2 beta
    ]

    kernel = functools.partial(_encoder_stack_kernel, num_heads, 1e-5)
    return pl.pallas_call(
        kernel,
        out_shape=jax.ShapeDtypeStruct((B, S, E), x_bse.dtype),
        grid_spec=pltpu.PrefetchScalarGridSpec(
            num_scalar_prefetch=0,
            grid=(B, L),
            in_specs=[pl.BlockSpec((1, S, E), x_map)] + w_specs,
            out_specs=pl.BlockSpec((1, S, E), x_map),
            scratch_shapes=[pltpu.VMEM((S, E), jnp.float32)],
        ),
        compiler_params=pltpu.CompilerParams(
            dimension_semantics=("parallel", "arbitrary"),
            vmem_limit_bytes=32 * 1024 * 1024,
        ),
    )(x_bse, wqkv, bqkv, wo, bo, w1, b1, w2, b2, g1, be1, g2, be2)


# ----------------------------------------------------------------------------
# Full Encoder forward (tiny prolog/epilog in XLA, whole stack in one Pallas call)
# ----------------------------------------------------------------------------
def encoder_forward(indices, emb_table, positional, packed_params, num_heads):
    B, S = indices.shape
    x = jnp.take(emb_table, indices, axis=0)            # (B, S, E) embedding gather
    x = x + positional[:S, 0, :][None, :, :]            # == permute + positional.repeat
    out = encoder_stack_pallas(x, packed_params, num_heads)   # (B, S, E)
    return jnp.transpose(out, (1, 0, 2))                # (S, B, E) like PyTorch


# ----------------------------------------------------------------------------
# Weight packing: stack layers, pre-transpose to (in, out), fuse Q/K/V
# ----------------------------------------------------------------------------
def pack_layer_params(layer_params):
    rows = []
    for (wq, bq, wk, bk, wv, bv, wo, bo, w1, b1, w2, b2, g1, be1, g2, be2) in layer_params:
        rows.append((
            jnp.concatenate([wq, wk, wv], axis=0).T,   # (E, 3E)
            jnp.concatenate([bq, bk, bv], axis=1),     # (1, 3E)
            wo.T, bo,                                  # (E, E), (1, E)
            w1.T, b1,                                  # (E, F), (1, F)
            w2.T, b2,                                  # (F, E), (1, E)
            g1, be1, g2, be2,                          # (1, E) each
        ))
    return tuple(jnp.stack(col, axis=0) for col in zip(*rows))


# ----------------------------------------------------------------------------
# Pure-JAX reference (same math, no Pallas) for the correctness check
# ----------------------------------------------------------------------------
def _ref_layer(x, params, num_heads, eps=1e-5):
    (wq, bq, wk, bk, wv, bv, wo, bo, w1, b1, w2, b2, g1, be1, g2, be2) = params
    B, S, E = x.shape
    Dh = E // num_heads
    lin = lambda a, w, b: jnp.einsum('bse,fe->bsf', a, w) + b
    q, k, v = lin(x, wq, bq), lin(x, wk, bk), lin(x, wv, bv)
    qh = q.reshape(B, S, num_heads, Dh)
    kh = k.reshape(B, S, num_heads, Dh)
    vh = v.reshape(B, S, num_heads, Dh)
    s = jnp.einsum('bqhd,bkhd->bhqk', qh, kh) / math.sqrt(Dh)
    p = jax.nn.softmax(s, axis=-1)
    attn = jnp.einsum('bhqk,bkhd->bqhd', p, vh).reshape(B, S, E)
    attn = lin(attn, wo, bo)
    ln = lambda a, g, b: ((a - a.mean(-1, keepdims=True))
                          * lax.rsqrt(a.var(-1, keepdims=True) + eps) * g + b)
    x = ln(x + attn, g1, be1)
    ff = jnp.einsum('bsf,ef->bse', jnp.maximum(lin(x, w1, b1), 0.0), w2) + b2
    return ln(x + ff, g2, be2)


def reference_forward(indices, emb_table, positional, layer_params, num_heads):
    B, S = indices.shape
    x = jnp.take(emb_table, indices, axis=0)
    x = jnp.transpose(x, (1, 0, 2)) + positional[:S]
    xb = jnp.transpose(x, (1, 0, 2))
    for p in layer_params:
        xb = _ref_layer(xb, p, num_heads)
    return jnp.transpose(xb, (1, 0, 2))


# ----------------------------------------------------------------------------
# Deterministic parameter construction (shapes from the module's __init__)
# ----------------------------------------------------------------------------
def init_params(key, vocab_size, emb_dim, feed_dim, num_heads, num_layers, seq_length):
    kemb, kpos, klayers = jax.random.split(key, 3)
    emb_table = jax.random.normal(kemb, (vocab_size * 2, emb_dim), jnp.float32) * 0.1
    positional = jax.random.normal(kpos, (2 * seq_length + 4, 1, emb_dim), jnp.float32) * 0.1

    def w(kk, shape, scale=0.08):
        return jax.random.normal(kk, shape, jnp.float32) * scale

    layers = []
    for lk in jax.random.split(klayers, num_layers):
        ks = jax.random.split(lk, 12)
        wq, wk_, wv, wo = (w(ks[i], (emb_dim, emb_dim)) for i in range(4))
        w1 = w(ks[4], (feed_dim, emb_dim))
        w2 = w(ks[5], (emb_dim, feed_dim))
        bq = w(ks[6], (1, emb_dim), 0.02)
        bk = w(ks[7], (1, emb_dim), 0.02)
        bv = w(ks[8], (1, emb_dim), 0.02)
        bo = w(ks[9], (1, emb_dim), 0.02)
        b1 = w(ks[10], (1, feed_dim), 0.02)
        b2 = w(ks[11], (1, emb_dim), 0.02)
        g1 = jnp.ones((1, emb_dim), jnp.float32)
        be1 = jnp.zeros((1, emb_dim), jnp.float32)
        g2 = jnp.ones((1, emb_dim), jnp.float32)
        be2 = jnp.zeros((1, emb_dim), jnp.float32)
        layers.append((wq, bq, wk_, bk, wv, bv, wo, bo,
                       w1, b1, w2, b2, g1, be1, g2, be2))
    return emb_table, positional, layers


if __name__ == "__main__":
    # args: VOCAB_SIZE=16, EMB_DIM=32, ATTN_HEAD=4, FEED_DIM=64, ENC_LAYERS=2, SEQ_LENGTH=8
    VOCAB_SIZE, EMB_DIM, ATTN_HEAD, FEED_DIM, ENC_LAYERS, SEQ_LENGTH = 16, 32, 4, 64, 2, 8
    BATCH = 2

    key = jax.random.PRNGKey(0)
    kparams, kidx = jax.random.split(key)
    emb_table, positional, layer_params = init_params(
        kparams, VOCAB_SIZE, EMB_DIM, FEED_DIM, ATTN_HEAD, ENC_LAYERS, SEQ_LENGTH)
    packed = pack_layer_params(layer_params)

    indices = jax.random.randint(kidx, (BATCH, SEQ_LENGTH), 0, 2 * VOCAB_SIZE, jnp.int32)

    run = jax.jit(functools.partial(encoder_forward, num_heads=ATTN_HEAD))
    out = run(indices, emb_table, positional, packed)
    out = jax.block_until_ready(out)

    ref = reference_forward(indices, emb_table, positional, layer_params, ATTN_HEAD)
    assert out.shape == (SEQ_LENGTH, BATCH, EMB_DIM)
    assert jnp.allclose(out, ref, atol=2e-4, rtol=2e-4)

    print("KERNEL_OK")
</pallas_src>

<mosaic_0001>
module attributes {stable_mosaic.version = 11 : i64} {
  func.func @_encoder_stack_kernel(%arg0: i32, %arg1: i32, %arg2: memref<1x8x32xf32, #tpu.memory_space<vmem>>, %arg3: memref<1x32x96xf32, #tpu.memory_space<vmem>>, %arg4: memref<1x1x96xf32, #tpu.memory_space<vmem>>, %arg5: memref<1x32x32xf32, #tpu.memory_space<vmem>>, %arg6: memref<1x1x32xf32, #tpu.memory_space<vmem>>, %arg7: memref<1x32x64xf32, #tpu.memory_space<vmem>>, %arg8: memref<1x1x64xf32, #tpu.memory_space<vmem>>, %arg9: memref<1x64x32xf32, #tpu.memory_space<vmem>>, %arg10: memref<1x1x32xf32, #tpu.memory_space<vmem>>, %arg11: memref<1x1x32xf32, #tpu.memory_space<vmem>>, %arg12: memref<1x1x32xf32, #tpu.memory_space<vmem>>, %arg13: memref<1x1x32xf32, #tpu.memory_space<vmem>>, %arg14: memref<1x1x32xf32, #tpu.memory_space<vmem>>, %arg15: memref<1x8x32xf32, #tpu.memory_space<vmem>>, %arg16: memref<8x32xf32, #tpu.memory_space<vmem>>) attributes {dimension_semantics = [#tpu.dimension_semantics<parallel>, #tpu.dimension_semantics<arbitrary>], iteration_bounds = array<i64: 2, 2>, scalar_prefetch = 0 : i64, scratch_operands = 1 : i64, tpu.core_type = #tpu.core_type<tc>, window_params = [{transform_indices = @transform_0, window_bounds = array<i64: 1, 8, 32>}, {transform_indices = @transform_1, window_bounds = array<i64: 1, 32, 96>}, {transform_indices = @transform_2, window_bounds = array<i64: 1, 1, 96>}, {transform_indices = @transform_3, window_bounds = array<i64: 1, 32, 32>}, {transform_indices = @transform_4, window_bounds = array<i64: 1, 1, 32>}, {transform_indices = @transform_5, window_bounds = array<i64: 1, 32, 64>}, {transform_indices = @transform_6, window_bounds = array<i64: 1, 1, 64>}, {transform_indices = @transform_7, window_bounds = array<i64: 1, 64, 32>}, {transform_indices = @transform_8, window_bounds = array<i64: 1, 1, 32>}, {transform_indices = @transform_9, window_bounds = array<i64: 1, 1, 32>}, {transform_indices = @transform_10, window_bounds = array<i64: 1, 1, 32>}, {transform_indices = @transform_11, window_bounds = array<i64: 1, 1, 32>}, {transform_indices = @transform_12, window_bounds = array<i64: 1, 1, 32>}, {transform_indices = @transform_13, window_bounds = array<i64: 1, 8, 32>}]} {
    %c0_i32 = arith.constant 0 : i32
    %0 = arith.cmpi eq, %arg1, %c0_i32 : i32
    %1 = arith.extui %0 : i1 to i32
    %c0_i32_0 = arith.constant 0 : i32
    %2 = arith.cmpi ne, %1, %c0_i32_0 : i32
    scf.if %2 {
      %c0_84 = arith.constant 0 : index
      %c0_85 = arith.constant 0 : index
      %c0_86 = arith.constant 0 : index
      %164 = vector.load %arg2[%c0_84, %c0_85, %c0_86] : memref<1x8x32xf32, #tpu.memory_space<vmem>>, vector<1x8x32xf32>
      %165 = vector.shape_cast %164 : vector<1x8x32xf32> to vector<8x32xf32>
      %c0_87 = arith.constant 0 : index
      %c0_88 = arith.constant 0 : index
      %166 = vector.load %arg16[%c0_87, %c0_88] : memref<8x32xf32, #tpu.memory_space<vmem>>, vector<8x32xf32>
      tpu.vector_store %arg16[%c0_87, %c0_88], %165 {strides = array<i32>} : memref<8x32xf32, #tpu.memory_space<vmem>>, vector<8x32xf32>,
    } else {
    }
    %c0 = arith.constant 0 : index
    %c0_1 = arith.constant 0 : index
    %3 = vector.load %arg16[%c0, %c0_1] : memref<8x32xf32, #tpu.memory_space<vmem>>, vector<8x32xf32>
    %c0_2 = arith.constant 0 : index
    %c0_3 = arith.constant 0 : index
    %c0_4 = arith.constant 0 : index
    %4 = vector.load %arg3[%c0_2, %c0_3, %c0_4] : memref<1x32x96xf32, #tpu.memory_space<vmem>>, vector<1x32x96xf32>
    %5 = vector.shape_cast %4 : vector<1x32x96xf32> to vector<32x96xf32>
    %cst = arith.constant dense<0.000000e+00> : vector<8x96xf32>
    %6 = tpu.matmul %3, %5, %cst {dimension_numbers = #tpu.dot_dimension_numbers<[1], [0], [0], [1], [0, 0, 1, 1], [], []>} : vector<8x32xf32>, vector<32x96xf32>, vector<8x96xf32> -> vector<8x96xf32>
    %c0_5 = arith.constant 0 : index
    %c0_6 = arith.constant 0 : index
    %c0_7 = arith.constant 0 : index
    %7 = vector.load %arg4[%c0_5, %c0_6, %c0_7] : memref<1x1x96xf32, #tpu.memory_space<vmem>>, vector<1x1x96xf32>
    %8 = vector.shape_cast %7 : vector<1x1x96xf32> to vector<1x96xf32>
    %9 = vector.broadcast %8 : vector<1x96xf32> to vector<8x96xf32>
    %10 = arith.addf %6, %9 : vector<8x96xf32>
    %11 = vector.extract_strided_slice %10 {offsets = [0, 0], sizes = [8, 8], strides = [1, 1]} : vector<8x96xf32> to vector<8x8xf32>
    %cst_8 = arith.constant 0.353553385 : f32
    %12 = vector.broadcast %cst_8 : f32 to vector<8x8xf32>
    %13 = arith.mulf %11, %12 : vector<8x8xf32>
    %14 = vector.extract_strided_slice %10 {offsets = [0, 32], sizes = [8, 8], strides = [1, 1]} : vector<8x96xf32> to vector<8x8xf32>
    %15 = vector.extract_strided_slice %10 {offsets = [0, 64], sizes = [8, 8], strides = [1, 1]} : vector<8x96xf32> to vector<8x8xf32>
    %cst_9 = arith.constant dense<0.000000e+00> : vector<8x8xf32>
    %16 = tpu.matmul %13, %14, %cst_9 {dimension_numbers = #tpu.dot_dimension_numbers<[1], [1], [0], [0], [0, 0, 1, 0], [], []>} : vector<8x8xf32>, vector<8x8xf32>, vector<8x8xf32> -> vector<8x8xf32>
    %cst_10 = arith.constant dense<0xFF800000> : vector<8xf32>
    %17 = vector.multi_reduction <maximumf>, %16, %cst_10 [1] : vector<8x8xf32> to vector<8xf32>
    %18 = vector.shape_cast %17 : vector<8xf32> to vector<8x1xf32>
    %19 = vector.broadcast %18 : vector<8x1xf32> to vector<8x8xf32>
    %20 = arith.subf %16, %19 : vector<8x8xf32>
    %21 = math.exp %20 : vector<8x8xf32>
    %cst_11 = arith.constant dense<0.000000e+00> : vector<8xf32>
    %22 = vector.multi_reduction <add>, %21, %cst_11 [1] : vector<8x8xf32> to vector<8xf32>
    %23 = vector.shape_cast %22 : vector<8xf32> to vector<8x1xf32>
    %24 = vector.broadcast %23 : vector<8x1xf32> to vector<8x8xf32>
    %25 = arith.divf %21, %24 : vector<8x8xf32>
    %cst_12 = arith.constant dense<0.000000e+00> : vector<8x8xf32>
    %26 = tpu.matmul %25, %15, %cst_12 {dimension_numbers = #tpu.dot_dimension_numbers<[1], [0], [0], [1], [0, 0, 1, 1], [], []>} : vector<8x8xf32>, vector<8x8xf32>, vector<8x8xf32> -> vector<8x8xf32>
    %c0_13 = arith.constant 0 : index
    %c0_14 = arith.constant 0 : index
    %c0_15 = arith.constant 0 : index
    %27 = vector.load %arg5[%c0_13, %c0_14, %c0_15] : memref<1x32x32xf32, #tpu.memory_space<vmem>>, vector<1x8x32xf32>
    %28 = vector.shape_cast %27 : vector<1x8x32xf32> to vector<8x32xf32>
    %cst_16 = arith.constant dense<0.000000e+00> : vector<8x32xf32>
    %29 = tpu.matmul %26, %28, %cst_16 {dimension_numbers = #tpu.dot_dimension_numbers<[1], [0], [0], [1], [0, 0, 1, 1], [], []>} : vector<8x8xf32>, vector<8x32xf32>, vector<8x32xf32> -> vector<8x32xf32>
    %30 = vector.extract_strided_slice %10 {offsets = [0, 8], sizes = [8, 8], strides = [1, 1]} : vector<8x96xf32> to vector<8x8xf32>
    %cst_17 = arith.constant 0.353553385 : f32
    %31 = vector.broadcast %cst_17 : f32 to vector<8x8xf32>
    %32 = arith.mulf %30, %31 : vector<8x8xf32>
    %33 = vector.extract_strided_slice %10 {offsets = [0, 40], sizes = [8, 8], strides = [1, 1]} : vector<8x96xf32> to vector<8x8xf32>
    %34 = vector.extract_strided_slice %10 {offsets = [0, 72], sizes = [8, 8], strides = [1, 1]} : vector<8x96xf32> to vector<8x8xf32>
    %cst_18 = arith.constant dense<0.000000e+00> : vector<8x8xf32>
    %35 = tpu.matmul %32, %33, %cst_18 {dimension_numbers = #tpu.dot_dimension_numbers<[1], [1], [0], [0], [0, 0, 1, 0], [], []>} : vector<8x8xf32>, vector<8x8xf32>, vector<8x8xf32> -> vector<8x8xf32>
    %cst_19 = arith.constant dense<0xFF800000> : vector<8xf32>
    %36 = vector.multi_reduction <maximumf>, %35, %cst_19 [1] : vector<8x8xf32> to vector<8xf32>
    %37 = vector.shape_cast %36 : vector<8xf32> to vector<8x1xf32>
    %38 = vector.broadcast %37 : vector<8x1xf32> to vector<8x8xf32>
    %39 = arith.subf %35, %38 : vector<8x8xf32>
    %40 = math.exp %39 : vector<8x8xf32>
    %cst_20 = arith.constant dense<0.000000e+00> : vector<8xf32>
    %41 = vector.multi_reduction <add>, %40, %cst_20 [1] : vector<8x8xf32> to vector<8xf32>
    %42 = vector.shape_cast %41 : vector<8xf32> to vector<8x1xf32>
    %43 = vector.broadcast %42 : vector<8x1xf32> to vector<8x8xf32>
    %44 = arith.divf %40, %43 : vector<8x8xf32>
    %cst_21 = arith.constant dense<0.000000e+00> : vector<8x8xf32>
    %45 = tpu.matmul %44, %34, %cst_21 {dimension_numbers = #tpu.dot_dimension_numbers<[1], [0], [0], [1], [0, 0, 1, 1], [], []>} : vector<8x8xf32>, vector<8x8xf32>, vector<8x8xf32> -> vector<8x8xf32>
    %c0_22 = arith.constant 0 : index
    %c8 = arith.constant 8 : index
    %c0_23 = arith.constant 0 : index
    %46 = vector.load %arg5[%c0_22, %c8, %c0_23] : memref<1x32x32xf32, #tpu.memory_space<vmem>>, vector<1x8x32xf32>
    %47 = vector.shape_cast %46 : vector<1x8x32xf32> to vector<8x32xf32>
    %cst_24 = arith.constant dense<0.000000e+00> : vector<8x32xf32>
    %48 = tpu.matmul %45, %47, %cst_24 {dimension_numbers = #tpu.dot_dimension_numbers<[1], [0], [0], [1], [0, 0, 1, 1], [], []>} : vector<8x8xf32>, vector<8x32xf32>, vector<8x32xf32> -> vector<8x32xf32>
    %49 = arith.addf %29, %48 : vector<8x32xf32>
    %50 = vector.extract_strided_slice %10 {offsets = [0, 16], sizes = [8, 8], strides = [1, 1]} : vector<8x96xf32> to vector<8x8xf32>
    %cst_25 = arith.constant 0.353553385 : f32
    %51 = vector.broadcast %cst_25 : f32 to vector<8x8xf32>
    %52 = arith.mulf %50, %51 : vector<8x8xf32>
    %53 = vector.extract_strided_slice %10 {offsets = [0, 48], sizes = [8, 8], strides = [1, 1]} : vector<8x96xf32> to vector<8x8xf32>
    %54 = vector.extract_strided_slice %10 {offsets = [0, 80], sizes = [8, 8], strides = [1, 1]} : vector<8x96xf32> to vector<8x8xf32>
    %cst_26 = arith.constant dense<0.000000e+00> : vector<8x8xf32>
    %55 = tpu.matmul %52, %53, %cst_26 {dimension_numbers = #tpu.dot_dimension_numbers<[1], [1], [0], [0], [0, 0, 1, 0], [], []>} : vector<8x8xf32>, vector<8x8xf32>, vector<8x8xf32> -> vector<8x8xf32>
    %cst_27 = arith.constant dense<0xFF800000> : vector<8xf32>
    %56 = vector.multi_reduction <maximumf>, %55, %cst_27 [1] : vector<8x8xf32> to vector<8xf32>
    %57 = vector.shape_cast %56 : vector<8xf32> to vector<8x1xf32>
    %58 = vector.broadcast %57 : vector<8x1xf32> to vector<8x8xf32>
    %59 = arith.subf %55, %58 : vector<8x8xf32>
    %60 = math.exp %59 : vector<8x8xf32>
    %cst_28 = arith.constant dense<0.000000e+00> : vector<8xf32>
    %61 = vector.multi_reduction <add>, %60, %cst_28 [1] : vector<8x8xf32> to vector<8xf32>
    %62 = vector.shape_cast %61 : vector<8xf32> to vector<8x1xf32>
    %63 = vector.broadcast %62 : vector<8x1xf32> to vector<8x8xf32>
    %64 = arith.divf %60, %63 : vector<8x8xf32>
    %cst_29 = arith.constant dense<0.000000e+00> : vector<8x8xf32>
    %65 = tpu.matmul %64, %54, %cst_29 {dimension_numbers = #tpu.dot_dimension_numbers<[1], [0], [0], [1], [0, 0, 1, 1], [], []>} : vector<8x8xf32>, vector<8x8xf32>, vector<8x8xf32> -> vector<8x8xf32>
    %c0_30 = arith.constant 0 : index
    %c16 = arith.constant 16 : index
    %c0_31 = arith.constant 0 : index
    %66 = vector.load %arg5[%c0_30, %c16, %c0_31] : memref<1x32x32xf32, #tpu.memory_space<vmem>>, vector<1x8x32xf32>
    %67 = vector.shape_cast %66 : vector<1x8x32xf32> to vector<8x32xf32>
    %cst_32 = arith.constant dense<0.000000e+00> : vector<8x32xf32>
    %68 = tpu.matmul %65, %67, %cst_32 {dimension_numbers = #tpu.dot_dimension_numbers<[1], [0], [0], [1], [0, 0, 1, 1], [], []>} : vector<8x8xf32>, vector<8x32xf32>, vector<8x32xf32> -> vector<8x32xf32>
    %69 = arith.addf %49, %68 : vector<8x32xf32>
    %70 = vector.extract_strided_slice %10 {offsets = [0, 24], sizes = [8, 8], strides = [1, 1]} : vector<8x96xf32> to vector<8x8xf32>
    %cst_33 = arith.constant 0.353553385 : f32
    %71 = vector.broadcast %cst_33 : f32 to vector<8x8xf32>
    %72 = arith.mulf %70, %71 : vector<8x8xf32>
    %73 = vector.extract_strided_slice %10 {offsets = [0, 56], sizes = [8, 8], strides = [1, 1]} : vector<8x96xf32> to vector<8x8xf32>
    %74 = vector.extract_strided_slice %10 {offsets = [0, 88], sizes = [8, 8], strides = [1, 1]} : vector<8x96xf32> to vector<8x8xf32>
    %cst_34 = arith.constant dense<0.000000e+00> : vector<8x8xf32>
    %75 = tpu.matmul %72, %73, %cst_34 {dimension_numbers = #tpu.dot_dimension_numbers<[1], [1], [0], [0], [0, 0, 1, 0], [], []>} : vector<8x8xf32>, vector<8x8xf32>, vector<8x8xf32> -> vector<8x8xf32>
    %cst_35 = arith.constant dense<0xFF800000> : vector<8xf32>
    %76 = vector.multi_reduction <maximumf>, %75, %cst_35 [1] : vector<8x8xf32> to vector<8xf32>
    %77 = vector.shape_cast %76 : vector<8xf32> to vector<8x1xf32>
    %78 = vector.broadcast %77 : vector<8x1xf32> to vector<8x8xf32>
    %79 = arith.subf %75, %78 : vector<8x8xf32>
    %80 = math.exp %79 : vector<8x8xf32>
    %cst_36 = arith.constant dense<0.000000e+00> : vector<8xf32>
    %81 = vector.multi_reduction <add>, %80, %cst_36 [1] : vector<8x8xf32> to vector<8xf32>
    %82 = vector.shape_cast %81 : vector<8xf32> to vector<8x1xf32>
    %83 = vector.broadcast %82 : vector<8x1xf32> to vector<8x8xf32>
    %84 = arith.divf %80, %83 : vector<8x8xf32>
    %cst_37 = arith.constant dense<0.000000e+00> : vector<8x8xf32>
    %85 = tpu.matmul %84, %74, %cst_37 {dimension_numbers = #tpu.dot_dimension_numbers<[1], [0], [0], [1], [0, 0, 1, 1], [], []>} : vector<8x8xf32>, vector<8x8xf32>, vector<8x8xf32> -> vector<8x8xf32>
    %c0_38 = arith.constant 0 : index
    %c24 = arith.constant 24 : index
    %c0_39 = arith.constant 0 : index
    %86 = vector.load %arg5[%c0_38, %c24, %c0_39] : memref<1x32x32xf32, #tpu.memory_space<vmem>>, vector<1x8x32xf32>
    %87 = vector.shape_cast %86 : vector<1x8x32xf32> to vector<8x32xf32>
    %cst_40 = arith.constant dense<0.000000e+00> : vector<8x32xf32>
    %88 = tpu.matmul %85, %87, %cst_40 {dimension_numbers = #tpu.dot_dimension_numbers<[1], [0], [0], [1], [0, 0, 1, 1], [], []>} : vector<8x8xf32>, vector<8x32xf32>, vector<8x32xf32> -> vector<8x32xf32>
    %89 = arith.addf %69, %88 : vector<8x32xf32>
    %c0_41 = arith.constant 0 : index
    %c0_42 = arith.constant 0 : index
    %c0_43 = arith.constant 0 : index
    %90 = vector.load %arg6[%c0_41, %c0_42, %c0_43] : memref<1x1x32xf32, #tpu.memory_space<vmem>>, vector<1x1x32xf32>
    %91 = vector.shape_cast %90 : vector<1x1x32xf32> to vector<1x32xf32>
    %92 = vector.broadcast %91 : vector<1x32xf32> to vector<8x32xf32>
    %93 = arith.addf %89, %92 : vector<8x32xf32>
    %94 = arith.addf %3, %93 : vector<8x32xf32>
    %c0_44 = arith.constant 0 : index
    %c0_45 = arith.constant 0 : index
    %c0_46 = arith.constant 0 : index
    %95 = vector.load %arg11[%c0_44, %c0_45, %c0_46] : memref<1x1x32xf32, #tpu.memory_space<vmem>>, vector<1x1x32xf32>
    %96 = vector.shape_cast %95 : vector<1x1x32xf32> to vector<1x32xf32>
    %c0_47 = arith.constant 0 : index
    %c0_48 = arith.constant 0 : index
    %c0_49 = arith.constant 0 : index
    %97 = vector.load %arg12[%c0_47, %c0_48, %c0_49] : memref<1x1x32xf32, #tpu.memory_space<vmem>>, vector<1x1x32xf32>
    %98 = vector.shape_cast %97 : vector<1x1x32xf32> to vector<1x32xf32>
    %cst_50 = arith.constant dense<0.000000e+00> : vector<8xf32>
    %99 = vector.multi_reduction <add>, %94, %cst_50 [1] : vector<8x32xf32> to vector<8xf32>
    %100 = vector.shape_cast %99 : vector<8xf32> to vector<8x1xf32>
    %cst_51 = arith.constant 3.200000e+01 : f32
    %101 = vector.broadcast %cst_51 : f32 to vector<8x1xf32>
    %102 = arith.divf %100, %101 : vector<8x1xf32>
    %103 = vector.broadcast %102 : vector<8x1xf32> to vector<8x32xf32>
    %104 = arith.subf %94, %103 : vector<8x32xf32>
    %105 = arith.mulf %104, %104 : vector<8x32xf32>
    %cst_52 = arith.constant dense<0.000000e+00> : vector<8xf32>
    %106 = vector.multi_reduction <add>, %105, %cst_52 [1] : vector<8x32xf32> to vector<8xf32>
    %107 = vector.shape_cast %106 : vector<8xf32> to vector<8x1xf32>
    %cst_53 = arith.constant 3.200000e+01 : f32
    %108 = vector.broadcast %cst_53 : f32 to vector<8x1xf32>
    %109 = arith.divf %107, %108 : vector<8x1xf32>
    %cst_54 = arith.constant 9.99999974E-6 : f32
    %110 = vector.broadcast %cst_54 : f32 to vector<8x1xf32>
    %111 = arith.addf %109, %110 : vector<8x1xf32>
    %112 = math.rsqrt %111 : vector<8x1xf32>
    %113 = vector.broadcast %112 : vector<8x1xf32> to vector<8x32xf32>
    %114 = arith.mulf %104, %113 : vector<8x32xf32>
    %115 = vector.broadcast %96 : vector<1x32xf32> to vector<8x32xf32>
    %116 = arith.mulf %114, %115 : vector<8x32xf32>
    %117 = vector.broadcast %98 : vector<1x32xf32> to vector<8x32xf32>
    %118 = arith.addf %116, %117 : vector<8x32xf32>
    %c0_55 = arith.constant 0 : index
    %c0_56 = arith.constant 0 : index
    %c0_57 = arith.constant 0 : index
    %119 = vector.load %arg7[%c0_55, %c0_56, %c0_57] : memref<1x32x64xf32, #tpu.memory_space<vmem>>, vector<1x32x64xf32>
    %120 = vector.shape_cast %119 : vector<1x32x64xf32> to vector<32x64xf32>
    %cst_58 = arith.constant dense<0.000000e+00> : vector<8x64xf32>
    %121 = tpu.matmul %118, %120, %cst_58 {dimension_numbers = #tpu.dot_dimension_numbers<[1], [0], [0], [1], [0, 0, 1, 1], [], []>} : vector<8x32xf32>, vector<32x64xf32>, vector<8x64xf32> -> vector<8x64xf32>
    %c0_59 = arith.constant 0 : index
    %c0_60 = arith.constant 0 : index
    %c0_61 = arith.constant 0 : index
    %122 = vector.load %arg8[%c0_59, %c0_60, %c0_61] : memref<1x1x64xf32, #tpu.memory_space<vmem>>, vector<1x1x64xf32>
    %123 = vector.shape_cast %122 : vector<1x1x64xf32> to vector<1x64xf32>
    %124 = vector.broadcast %123 : vector<1x64xf32> to vector<8x64xf32>
    %125 = arith.addf %121, %124 : vector<8x64xf32>
    %cst_62 = arith.constant 0.000000e+00 : f32
    %126 = vector.broadcast %cst_62 : f32 to vector<8x64xf32>
    %127 = arith.maximumf %125, %126 : vector<8x64xf32>
    %c0_63 = arith.constant 0 : index
    %c0_64 = arith.constant 0 : index
    %c0_65 = arith.constant 0 : index
    %128 = vector.load %arg9[%c0_63, %c0_64, %c0_65] : memref<1x64x32xf32, #tpu.memory_space<vmem>>, vector<1x64x32xf32>
    %129 = vector.shape_cast %128 : vector<1x64x32xf32> to vector<64x32xf32>
    %cst_66 = arith.constant dense<0.000000e+00> : vector<8x32xf32>
    %130 = tpu.matmul %127, %129, %cst_66 {dimension_numbers = #tpu.dot_dimension_numbers<[1], [0], [0], [1], [0, 0, 1, 1], [], []>} : vector<8x64xf32>, vector<64x32xf32>, vector<8x32xf32> -> vector<8x32xf32>
    %c0_67 = arith.constant 0 : index
    %c0_68 = arith.constant 0 : index
    %c0_69 = arith.constant 0 : index
    %131 = vector.load %arg10[%c0_67, %c0_68, %c0_69] : memref<1x1x32xf32, #tpu.memory_space<vmem>>, vector<1x1x32xf32>
    %132 = vector.shape_cast %131 : vector<1x1x32xf32> to vector<1x32xf32>
    %133 = vector.broadcast %132 : vector<1x32xf32> to vector<8x32xf32>
    %134 = arith.addf %130, %133 : vector<8x32xf32>
    %135 = arith.addf %118, %134 : vector<8x32xf32>
    %c0_70 = arith.constant 0 : index
    %c0_71 = arith.constant 0 : index
    %c0_72 = arith.constant 0 : index
    %136 = vector.load %arg13[%c0_70, %c0_71, %c0_72] : memref<1x1x32xf32, #tpu.memory_space<vmem>>, vector<1x1x32xf32>
    %137 = vector.shape_cast %136 : vector<1x1x32xf32> to vector<1x32xf32>
    %c0_73 = arith.constant 0 : index
    %c0_74 = arith.constant 0 : index
    %c0_75 = arith.constant 0 : index
    %138 = vector.load %arg14[%c0_73, %c0_74, %c0_75] : memref<1x1x32xf32, #tpu.memory_space<vmem>>, vector<1x1x32xf32>
    %139 = vector.shape_cast %138 : vector<1x1x32xf32> to vector<1x32xf32>
    %cst_76 = arith.constant dense<0.000000e+00> : vector<8xf32>
    %140 = vector.multi_reduction <add>, %135, %cst_76 [1] : vector<8x32xf32> to vector<8xf32>
    %141 = vector.shape_cast %140 : vector<8xf32> to vector<8x1xf32>
    %cst_77 = arith.constant 3.200000e+01 : f32
    %142 = vector.broadcast %cst_77 : f32 to vector<8x1xf32>
    %143 = arith.divf %141, %142 : vector<8x1xf32>
    %144 = vector.broadcast %143 : vector<8x1xf32> to vector<8x32xf32>
    %145 = arith.subf %135, %144 : vector<8x32xf32>
    %146 = arith.mulf %145, %145 : vector<8x32xf32>
    %cst_78 = arith.constant dense<0.000000e+00> : vector<8xf32>
    %147 = vector.multi_reduction <add>, %146, %cst_78 [1] : vector<8x32xf32> to vector<8xf32>
    %148 = vector.shape_cast %147 : vector<8xf32> to vector<8x1xf32>
    %cst_79 = arith.constant 3.200000e+01 : f32
    %149 = vector.broadcast %cst_79 : f32 to vector<8x1xf32>
    %150 = arith.divf %148, %149 : vector<8x1xf32>
    %cst_80 = arith.constant 9.99999974E-6 : f32
    %151 = vector.broadcast %cst_80 : f32 to vector<8x1xf32>
    %152 = arith.addf %150, %151 : vector<8x1xf32>
    %153 = math.rsqrt %152 : vector<8x1xf32>
    %154 = vector.broadcast %153 : vector<8x1xf32> to vector<8x32xf32>
    %155 = arith.mulf %145, %154 : vector<8x32xf32>
    %156 = vector.broadcast %137 : vector<1x32xf32> to vector<8x32xf32>
    %157 = arith.mulf %155, %156 : vector<8x32xf32>
    %158 = vector.broadcast %139 : vector<1x32xf32> to vector<8x32xf32>
    %159 = arith.addf %157, %158 : vector<8x32xf32>
    %c0_81 = arith.constant 0 : index
    %c0_82 = arith.constant 0 : index
    %160 = vector.load %arg16[%c0_81, %c0_82] : memref<8x32xf32, #tpu.memory_space<vmem>>, vector<8x32xf32>
    tpu.vector_store %arg16[%c0_81, %c0_82], %159 {strides = array<i32>} : memref<8x32xf32, #tpu.memory_space<vmem>>, vector<8x32xf32>,
    %c1_i32 = arith.constant 1 : i32
    %161 = arith.cmpi eq, %arg1, %c1_i32 : i32
    %162 = arith.extui %161 : i1 to i32
    %c0_i32_83 = arith.constant 0 : i32
    %163 = arith.cmpi ne, %162, %c0_i32_83 : i32
    scf.if %163 {
      %c0_84 = arith.constant 0 : index
      %c0_85 = arith.constant 0 : index
      %c0_86 = arith.constant 0 : index
      %164 = vector.load %arg15[%c0_84, %c0_85, %c0_86] : memref<1x8x32xf32, #tpu.memory_space<vmem>>, vector<1x8x32xf32>
      %165 = vector.shape_cast %164 : vector<1x8x32xf32> to vector<8x32xf32>
      %166 = vector.shape_cast %159 : vector<8x32xf32> to vector<1x8x32xf32>
      tpu.vector_store %arg15[%c0_84, %c0_85, %c0_86], %166 {strides = array<i32>} : memref<1x8x32xf32, #tpu.memory_space<vmem>>, vector<1x8x32xf32>,
    } else {
    }
    return
  }
  func.func @transform_0(%arg0: i32, %arg1: i32) -> (i32, i32, i32) {
    %c0_i32 = arith.constant 0 : i32
    %c0_i32_0 = arith.constant 0 : i32
    %c0_i32_1 = arith.constant 0 : i32
    return %arg0, %c0_i32, %c0_i32_0 : i32, i32, i32
  }
  func.func @transform_1(%arg0: i32, %arg1: i32) -> (i32, i32, i32) {
    %c0_i32 = arith.constant 0 : i32
    %c0_i32_0 = arith.constant 0 : i32
    %c0_i32_1 = arith.constant 0 : i32
    return %arg1, %c0_i32, %c0_i32_0 : i32, i32, i32
  }
  func.func @transform_2(%arg0: i32, %arg1: i32) -> (i32, i32, i32) {
    %c0_i32 = arith.constant 0 : i32
    %c0_i32_0 = arith.constant 0 : i32
    %c0_i32_1 = arith.constant 0 : i32
    return %arg1, %c0_i32, %c0_i32_0 : i32, i32, i32
  }
  func.func @transform_3(%arg0: i32, %arg1: i32) -> (i32, i32, i32) {
    %c0_i32 = arith.constant 0 : i32
    %c0_i32_0 = arith.constant 0 : i32
    %c0_i32_1 = arith.constant 0 : i32
    return %arg1, %c0_i32, %c0_i32_0 : i32, i32, i32
  }
  func.func @transform_4(%arg0: i32, %arg1: i32) -> (i32, i32, i32) {
    %c0_i32 = arith.constant 0 : i32
    %c0_i32_0 = arith.constant 0 : i32
    %c0_i32_1 = arith.constant 0 : i32
    return %arg1, %c0_i32, %c0_i32_0 : i32, i32, i32
  }
  func.func @transform_5(%arg0: i32, %arg1: i32) -> (i32, i32, i32) {
    %c0_i32 = arith.constant 0 : i32
    %c0_i32_0 = arith.constant 0 : i32
    %c0_i32_1 = arith.constant 0 : i32
    return %arg1, %c0_i32, %c0_i32_0 : i32, i32, i32
  }
  func.func @transform_6(%arg0: i32, %arg1: i32) -> (i32, i32, i32) {
    %c0_i32 = arith.constant 0 : i32
    %c0_i32_0 = arith.constant 0 : i32
    %c0_i32_1 = arith.constant 0 : i32
    return %arg1, %c0_i32, %c0_i32_0 : i32, i32, i32
  }
  func.func @transform_7(%arg0: i32, %arg1: i32) -> (i32, i32, i32) {
    %c0_i32 = arith.constant 0 : i32
    %c0_i32_0 = arith.constant 0 : i32
    %c0_i32_1 = arith.constant 0 : i32
    return %arg1, %c0_i32, %c0_i32_0 : i32, i32, i32
  }
  func.func @transform_8(%arg0: i32, %arg1: i32) -> (i32, i32, i32) {
    %c0_i32 = arith.constant 0 : i32
    %c0_i32_0 = arith.constant 0 : i32
    %c0_i32_1 = arith.constant 0 : i32
    return %arg1, %c0_i32, %c0_i32_0 : i32, i32, i32
  }
  func.func @transform_9(%arg0: i32, %arg1: i32) -> (i32, i32, i32) {
    %c0_i32 = arith.constant 0 : i32
    %c0_i32_0 = arith.constant 0 : i32
    %c0_i32_1 = arith.constant 0 : i32
    return %arg1, %c0_i32, %c0_i32_0 : i32, i32, i32
  }
  func.func @transform_10(%arg0: i32, %arg1: i32) -> (i32, i32, i32) {
    %c0_i32 = arith.constant 0 : i32
    %c0_i32_0 = arith.constant 0 : i32
    %c0_i32_1 = arith.constant 0 : i32
    return %arg1, %c0_i32, %c0_i32_0 : i32, i32, i32
  }
  func.func @transform_11(%arg0: i32, %arg1: i32) -> (i32, i32, i32) {
    %c0_i32 = arith.constant 0 : i32
    %c0_i32_0 = arith.constant 0 : i32
    %c0_i32_1 = arith.constant 0 : i32
    return %arg1, %c0_i32, %c0_i32_0 : i32, i32, i32
  }
  func.func @transform_12(%arg0: i32, %arg1: i32) -> (i32, i32, i32) {
    %c0_i32 = arith.constant 0 : i32
    %c0_i32_0 = arith.constant 0 : i32
    %c0_i32_1 = arith.constant 0 : i32
    return %arg1, %c0_i32, %c0_i32_0 : i32, i32, i32
  }
  func.func @transform_13(%arg0: i32, %arg1: i32) -> (i32, i32, i32) {
    %c0_i32 = arith.constant 0 : i32
    %c0_i32_0 = arith.constant 0 : i32
    %c0_i32_1 = arith.constant 0 : i32
    return %arg0, %c0_i32, %c0_i32_0 : i32, i32, i32
  }
}

</mosaic_0001>

<bundles_post_ra>
// kernel: encoder_forward.1
= control target key start
LH: loop header
LB: loop body
LE: loop exit
PB: predicated region body
PF: predicated region fallthrough
CT: control target
= control target key end

     0   :  { %s2516_s25 = smov 0   ;;  %s2518_s26 = smov 0   ;;  %s2803_s0 = inlined_call_operand.vmem [shape: f32[2,8,32], index: 0, kind: input, shape index: {}]   ;;  %s2804_s1 = inlined_call_operand.vmem [shape: f32[2,32,96], index: 1, kind: input, shape index: {}]   ;;  %s2805_s2 = inlined_call_operand.vmem [shape: f32[2,1,96], index: 2, kind: input, shape index: {}]   ;;  %s2806_s3 = inlined_call_operand.vmem [shape: f32[2,32,32], index: 3, kind: input, shape index: {}]   ;;  %s2807_s4 = inlined_call_operand.vmem [shape: f32[2,1,32], index: 4, kind: input, shape index: {}]   ;;  %s2808_s5 = inlined_call_operand.vmem [shape: f32[2,32,64], index: 5, kind: input, shape index: {}]   ;;  %s2809_s6 = inlined_call_operand.vmem [shape: f32[2,1,64], index: 6, kind: input, shape index: {}]   ;;  %s2810_s7 = inlined_call_operand.vmem [shape: f32[2,64,32], index: 7, kind: input, shape index: {}]   ;;  %s2811_s8 = inlined_call_operand.vmem [shape: f32[2,1,32], index: 8, kind: input, shape index: {}]   ;;  %s2812_s9 = inlined_call_operand.vmem [shape: f32[2,1,32], index: 9, kind: input, shape index: {}]   ;;  %s2813_s10 = inlined_call_operand.vmem [shape: f32[2,1,32], index: 10, kind: input, shape index: {}]   ;;  %s2814_s11 = inlined_call_operand.vmem [shape: f32[2,1,32], index: 11, kind: input, shape index: {}]   ;;  %s2815_s12 = inlined_call_operand.vmem [shape: f32[2,1,32], index: 12, kind: input, shape index: {}]   ;;  %s2816_s13 = inlined_call_operand.vmem [shape: f32[2,8,32], index: 13, kind: output, shape index: {}]  }
   0x1   :  { %2822 = sst [smem:[#allocation10_spill]] %s2803_s0  ;;  %s2520_s27 = smov 0  }
   0x2   :  { %2823 = sst [smem:[#allocation11_spill]] %s2804_s1  ;;  %s2522_s28 = smov 0  }
   0x3   :  { %2824 = sst [smem:[#allocation12_spill]] %s2806_s3  ;;  %s2524_s29 = smov 0  }
   0x4   :  { %2825 = sst [smem:[#allocation13_spill]] %s2808_s5 }
   0x5   :  { %2826 = sst [smem:[#allocation14_spill]] %s2810_s7 }
   0x6   :  { %2827 = sst [smem:[#allocation15_spill]] %s2816_s13 }
   0x7 LB: > { %2828 = sst [smem:[#allocation3_spill]] %s2415_s25  ;;  %s32_s30 = sadd.s32 1, %s2423_s27  ;;  %s2431_s29 = sphi %s2524_s29, %s23_s29   ;;  %s2427_s28 = sphi %s2522_s28, %s2852_s28   ;;  %s2423_s27 = sphi %s2520_s27, %s2851_s27   ;;  %s2419_s26 = sphi %s2518_s26, %s2850_s26   ;;  %s2415_s25 = sphi %s2516_s25, %s2849_s25  }
   0x8   : > { %2829 = sst [smem:[#allocation4_spill]] %s2423_s27  ;;  %s35_s14 = sadd.s32 1, %s2427_s28 }
   0x9   : > { %2830 = sst [smem:[#allocation5_spill]] %s2427_s28  ;;  %p33_p0 = scmp.ge.s32.totalorder %s32_s30, 2 }
   0xa   : > { %2831 = sst [smem:[#allocation6_spill]] %s2431_s29  ;;  %p2130_p1 = scmp.ge.s32.totalorder %s2431_s29, 1 }
   0xb   : > { %p502_p2 = scmp.lt.s32.totalorder %s2431_s29, 5  ;;  %s2854_s30 = smov (%p33_p0, %s32_s30), 0 }
   0xc   : > { %2832 = sst [smem:[#allocation7_spill]] %s2854_s30  ;;  %s2856_s14 = smov (!%p33_p0, %s35_s14), %s2427_s28 }
   0xd   : > { %p503_p3 = pnand %p2130_p1, %p502_p2  ;;  %p37_p4 = scmp.ge.s32.totalorder %s2856_s14, 2 }
   0xf   : > { %s2858_s14 = smov (%p37_p4, %s2856_s14), 0  ;;  %506 = sbr.rel (%p503_p3) target bundleno = 3494 (0xda6), region = 72 }
  0x10   : > { %2833 = sst [smem:[#allocation8_spill]] %s2858_s14 }
  0x14   : > { %p588_p5 = scmp.lt.s32.totalorder %s2419_s26, 1  ;;  %p592_p6 = scmp.lt.s32.totalorder %s2415_s25, 1 }
  0x15   : > { %s2834_s0 = sld [smem:[#allocation10_spill]] }
  0x16   : > { %s2860_s26 = smov (!%p588_p5, %s2419_s26), 1  ;;  %s2835_s1 = sld [smem:[#allocation11_spill]] }
  0x17   : > { %s2550_s15 = scalar_select %p592_p6, %s2415_s25, 1 }
  0x18   : > { %s2131_s16 = sshll.u32 %s2860_s26, 3  ;;  %s2836_s3 = sld [smem:[#allocation12_spill]] }
  0x19   : > { %s2172_s20 = sshll.u32 %s2550_s15, 5  ;;  %s2838_s5 = sld [smem:[#allocation13_spill]] }
  0x1a   : > { %s2175_s14 = sshll.u32 %s2550_s15, 6  ;;  %s2839_s7 = sld [smem:[#allocation14_spill]] }
  0x1b   : > { %s591_s19 = scalar_lea.vmem %s2834_s0, %s2131_s16  ;;  %s626_s0 = scalar_lea.vmem %s2812_s9, %s2550_s15 }
  0x1c   : > { %s2559_s23 = scalar_lea.vmem %s2835_s1, %s2172_s20  ;;  %s629_s17 = scalar_lea.vmem %s2813_s10, %s2550_s15 }
  0x1d   : > { %s632_s1 = scalar_lea.vmem %s2814_s11, %s2550_s15  ;;  %s635_s24 = scalar_lea.vmem %s2815_s12, %s2550_s15 }
  0x1e   : > { %s2568_s29 = scalar_lea.vmem %s2836_s3, %s2172_s20 }
  0x1f   : > { %2837 = sst [smem:[#allocation9_spill]] %s2568_s29  ;;  %s2577_s13 = scalar_lea.vmem %s2838_s5, %s2172_s20 }
  0x20   : > { %s2591_s29 = scalar_lea.vmem %s2839_s7, %s2175_s14  ;;  %s2840_s14 = sld [smem:[#allocation15_spill]] }
  0x21   : > { %s2841_s7 = sld [smem:[#allocation3_spill]] }
  0x26   : > { %s2612_s28 = scalar_lea.vmem %s2840_s14, %s2131_s16 }
  0x27   : > { %p2141_p7 = scmp.ne.s32.totalorder %s2841_s7, 0 }
  0x29   : > { %643 = sbr.rel (%p2141_p7) target bundleno = 48 (0x30), region = 76 }
  0x2e   : > { %v644_v0 = vld [vmem:[%s591_s19] sm:$0xff]  ;;  %vm645_vm0 = vcmask 261120  }
  0x2f   : > { %646 = vst.msk [vmem:[#allocation2] sm:$0xff] %vm645_vm0, %v644_v0 }
  0x30 PF: > { %v651_v1 = vld [vmem:[%s2559_s23 + $0x18] sm:$0xff]  ;;  %v2433_v2 = vmov 0.0   ;;  %v650_v3 = vld [vmem:[%s2559_s23 + $0x10] sm:$0xff]  ;;  %vm2434_vm1 = vmmov 0   ;;  %v649_v4 = vld [vmem:[%s2559_s23 + $0x8] sm:$0xff]  ;;  %vm659_vm2 = vcmask 261120   ;;  %s2842_s16 = scalar_lea.vmem %s2805_s2, %s2550_s15 }
  0x31   : > { %2219 = vmatprep.subr.mxu0 %v2433_v2  ;;  %2227 = vmatprep.mubr.msk.f32.mxu0 %vm2434_vm1, %v2433_v2  ;;  %v648_v5 = vld [vmem:[%s2559_s23] sm:$0xff]  ;;  %s2435_s19 = smov 96   ;;  %s2436_s23 = smov 120   ;;  %vm737_vm3 = vcmask 64512   ;;  %vm1832_vm4 = vcmask 523264  }
  0x32   : > { %2220 = vmatpush3.msra.mxu0 %v651_v1  ;;  %2235 = vmatprep.subr.mxu1 %v2433_v2  ;;  %v2142_v7 = vld [vmem:[%s2842_s16] ss:$0 sm:$0xff]  ;;  %s2437_s27 = smov 88   ;;  %s2438_s25 = smov 56  }
  0x33   : > { %2221 = vmatprep.subr.mxu0 %v2433_v2  ;;  %2237 = vmatprep.mubr.msk.f32.mxu1 %vm2434_vm1, %v2433_v2  ;;  %s2439_s26 = smov 64   ;;  %s2440_s20 = smov 80  }
  0x34   : > { %2222 = vmatpush3.msra.mxu0 %v650_v3  ;;  %s2441_s18 = smov 112   ;;  %s2843_s21 = sld [smem:[#allocation9_spill]] }
  0x35   : > { %2223 = vmatprep.subr.mxu0 %v2433_v2  ;;  %s2442_s22 = smov 72   ;;  %s2443_s30 = smov 104  }
  0x36   : > { %2224 = vmatpush3.msra.mxu0 %v649_v4  ;;  %v2627_v6 = vld [vmem:[#allocation2] sm:$0xff]  ;;  %s2444_s3 = smov 48   ;;  %s2445_s14 = smov 40  }
  0x37   : > { %2225 = vmatprep.subr.mxu0 %v2433_v2  ;;  %s2844_s16 = scalar_lea.vmem %s2807_s4, %s2550_s15 }
  0x38   : > { %2226 = vmatpush3.msra.mxu0 %v648_v5 }
  0x39   : > { %2228 = vmatmul.mubr.msk.f32.vlgmr.msra.gmra.mxu0 %vm659_vm2, %v2627_v6  ;;  %2230 = vmatprep.subr.mxu0 %v2433_v2 }
  0x3a   : > { %2232 = vmatprep.mubr.msk.f32.mxu0 %vm2434_vm1, %v2433_v2  ;;  %v900_v39 = vld [vmem:[%s2843_s21] sm:$0xff]  ;;  %v1066_v40 = vld [vmem:[%s2843_s21 + $0x8] sm:$0xff]  ;;  %v1378_v3 = vld [vmem:[%s2843_s21 + $0x10] sm:$0xff] }
  0xf9   : > { %v729_v8 = vpop.f32.mrf.mxu0 }
  0xfa   : > { %v2640_v9 = vadd.f32 %v2142_v7, %v729_v8 }
  0xfb   : > { %v2229_v10 = vpop.f32.mrf.mxu0 }
  0xfc   : > { %735 = vrot.lane.b32.xlu0 %v2640_v9, %s2435_s19  ;;  %v2644_v11 = vmul.f32 0.35355338, %v2640_v9 }
  0xfe   : > { %901 = vrot.lane.b32.xlu1 %v2644_v11, %s2436_s23 }
 0x100   : > { %903 = vrot.lane.b32.xlu0 %v2640_v9, %s2437_s27 }
 0x16e   : > { %v736_v12 = vpop.permute.xlu0 %735 }
 0x16f   : > { %2231 = vmatpush3.xpose.msk.msra.mxu0 %vm737_vm3, %v736_v12 }
 0x170   : > { %2240 = vmatprep.subr.mxu0 %v2433_v2  ;;  %v902_v14 = vpop.permute.xlu1 %901 }
 0x172   : > { %v904_v13 = vpop.permute.xlu0 %903  ;;  %2233 = vmatmul.mubr.msk.f32.vlgmr.msra.gmra.mxu0 %vm737_vm3, %v2644_v11 }
 0x173   : > { %2241 = vmatpush3.xpose.msk.msra.mxu0 %vm737_vm3, %v904_v13  ;;  %2242 = vmatprep.mubr.msk.f32.mxu0 %vm2434_vm1, %v2433_v2 }
 0x174   : > { %2250 = vmatprep.subr.mxu0 %v2433_v2 }
 0x176   : > { %2243 = vmatmul.mubr.msk.f32.vlgmr.msra.gmra.mxu0 %vm737_vm3, %v902_v14 }
 0x177   : > { %2252 = vmatprep.mubr.msk.f32.mxu0 %vm2434_vm1, %v2433_v2  ;;  %2251 = vmatpush3.msra.mxu0 %v1066_v40  ;;  %v1824_v40 = vld [vmem:[%s2591_s29 + $0x38] sm:$0xff] }
 0x178   : > { %2260 = vmatprep.subr.mxu0 %v2433_v2 }
 0x232   : > { %v809_v15 = vpop.f32.mrf.mxu0 }
 0x233   : > { %v813_v16 = vsel %vm737_vm3, %v809_v15, -inf }
 0x234   : > { %814 = vmax.xlane.f32.xlu1 %v813_v16  ;;  %v2234_v17 = vpop.f32.mrf.mxu0 }
 0x235   : > { %v1618_v17 = vld [vmem:[%s2843_s21 + $0x18] sm:$0xff] }
 0x236   : > { %v975_v18 = vpop.f32.mrf.mxu0 }
 0x237   : > { %v979_v19 = vsel %vm737_vm3, %v975_v18, -inf }
 0x238   : > { %980 = vmax.xlane.f32.xlu0 %v979_v19  ;;  %v2244_v20 = vpop.f32.mrf.mxu0 }
 0x2bd   : > { %v815_v21 = vpop.xlane.xlu1 %814 }
 0x2be   : > { %v816_v22 = vsub.f32 %v809_v15, %v815_v21 }
 0x2c0   : > { %v817_v23 = vmul.f32 1.442695, %v816_v22 }
 0x2c1   : > { %v981_v24 = vpop.xlane.xlu0 %980 }
 0x2c2   : > { %2373 = vpow2.f32 %v817_v23  ;;  %v982_v25 = vsub.f32 %v975_v18, %v981_v24 }
 0x2c4   : > { %v983_v26 = vmul.f32 1.442695, %v982_v25 }
 0x2c6   : > { %2375 = vpow2.f32 %v983_v26  ;;  %v2160_v26 = vld [vmem:[%s2844_s16] ss:$0 sm:$0xff] }
 0x2cf   : > { %v2374_v27 = vpop.eup %2373 }
 0x2d0   : > { %v819_v28 = vsel %vm737_vm3, %v2374_v27, 0.0 }
 0x2d1   : > { %820 = vadd.xlane.f32.xlu0 %v819_v28 }
 0x2d3   : > { %v2376_v29 = vpop.eup %2375 }
 0x2d4   : > { %v985_v30 = vsel %vm737_vm3, %v2376_v29, 0.0 }
 0x2d5   : > { %986 = vadd.xlane.f32.xlu1 %v985_v30 }
 0x2e6   : > { %990 = vrot.lane.b32.xlu1 %v2640_v9, %s2438_s25 }
 0x2e7   : > { %824 = vrot.lane.b32.xlu0 %v2640_v9, %s2439_s26  ;;  %s2845_s26 = scalar_lea.vmem %s2809_s6, %s2550_s15 }
 0x2ea   : > { %1215 = vrot.lane.b32.xlu1 %v2640_v9, %s2440_s20 }
 0x2eb   : > { %1213 = vrot.lane.b32.xlu0 %v2644_v11, %s2441_s18  ;;  %s2846_s18 = scalar_lea.vmem %s2811_s8, %s2550_s15 }
 0x35a   : > { %v821_v31 = vpop.xlane.xlu0 %820 }
 0x35b   : > { %2377 = vrcp.f32 %v821_v31 }
 0x35e   : > { %v987_v32 = vpop.xlane.xlu1 %986  ;;  %v825_v33 = vpop.permute.xlu0 %824 }
 0x35f   : > { %2379 = vrcp.f32 %v987_v32  ;;  %2236 = vmatpush3.msra.mxu1 %v825_v33 }
 0x360   : > { %2245 = vmatprep.subr.mxu1 %v2433_v2 }
 0x362   : > { %v991_v36 = vpop.permute.xlu1 %990  ;;  %v1214_v46 = vpop.permute.xlu0 %1213 }
 0x366   : > { %v1216_v44 = vpop.permute.xlu1 %1215 }
 0x368   : > { %v2378_v34 = vpop.eup %2377 }
 0x369   : > { %v823_v35 = vmul.f32 %v2378_v34, %v2374_v27 }
 0x36b   : > { %2238 = vmatmul.mubr.msk.f32.vlgmr.msra.gmra.mxu1 %vm737_vm3, %v823_v35 }
 0x36c   : > { %v2380_v37 = vpop.eup %2379  ;;  %2246 = vmatpush3.msra.mxu1 %v991_v36  ;;  %2247 = vmatprep.mubr.msk.f32.mxu1 %vm2434_vm1, %v2433_v2 }
 0x36d   : > { %v989_v38 = vmul.f32 %v2380_v37, %v2376_v29  ;;  %2255 = vmatprep.subr.mxu1 %v2433_v2  ;;  %v1735_v37 = vld [vmem:[%s2577_s13 + $0x18] sm:$0xff] }
 0x36f   : > { %2248 = vmatmul.mubr.msk.f32.vlgmr.msra.gmra.mxu1 %vm737_vm3, %v989_v38  ;;  %v1734_v38 = vld [vmem:[%s2577_s13 + $0x10] sm:$0xff] }
 0x370   : > { %2257 = vmatprep.mubr.msk.f32.mxu1 %vm2434_vm1, %v2433_v2  ;;  %2256 = vmatpush3.msra.mxu1 %v900_v39  ;;  %v1732_v39 = vld [vmem:[%s2577_s13] sm:$0xff] }
 0x371   : > { %2265 = vmatprep.subr.mxu1 %v2433_v2 }
 0x42b   : > { %v896_v41 = vpop.f32.mrf.mxu1 }
 0x42c   : > { %2258 = vmatmul.mubr.msk.f32.vlgmr.msra.gmra.mxu1 %vm737_vm3, %v896_v41  ;;  %v1823_v41 = vld [vmem:[%s2591_s29 + $0x30] sm:$0xff] }
 0x42d   : > { %v2239_v42 = vpop.f32.mrf.mxu1  ;;  %2267 = vmatprep.mubr.msk.f32.mxu1 %vm2434_vm1, %v2433_v2 }
 0x42e   : > { %v1822_v42 = vld [vmem:[%s2591_s29 + $0x28] sm:$0xff] }
 0x42f   : > { %v1062_v43 = vpop.f32.mrf.mxu1 }
 0x430   : > { %2253 = vmatmul.mubr.msk.f32.vlgmr.msra.gmra.mxu0 %vm737_vm3, %v1062_v43  ;;  %v1821_v43 = vld [vmem:[%s2591_s29 + $0x20] sm:$0xff] }
 0x431   : > { %2261 = vmatpush3.xpose.msk.msra.mxu0 %vm737_vm3, %v1216_v44  ;;  %v2249_v45 = vpop.f32.mrf.mxu1  ;;  %2262 = vmatprep.mubr.msk.f32.mxu0 %vm2434_vm1, %v2433_v2  ;;  %v1820_v44 = vld [vmem:[%s2591_s29 + $0x18] sm:$0xff] }
 0x432   : > { %2270 = vmatprep.subr.mxu0 %v2433_v2 }
 0x434   : > { %2263 = vmatmul.mubr.msk.f32.vlgmr.msra.gmra.mxu0 %vm737_vm3, %v1214_v46 }
 0x435   : > { %2272 = vmatprep.mubr.msk.f32.mxu0 %vm2434_vm1, %v2433_v2  ;;  %2271 = vmatpush3.msra.mxu0 %v1378_v3 }
 0x436   : > { %2280 = vmatprep.subr.mxu0 %v2433_v2 }
 0x4ec   : > { %v1209_v47 = vpop.f32.mrf.mxu1 }
 0x4ee   : > { %v2259_v48 = vpop.f32.mrf.mxu1 }
 0x4f0   : > { %v1136_v49 = vpop.f32.mrf.mxu0 }
 0x4f1   : > { %v1210_v50 = vadd.f32 %v1209_v47, %v1136_v49  ;;  %v2161_v49 = vld [vmem:[%s626_s0] ss:$0 sm:$0xff] }
 0x4f2   : > { %v2254_v51 = vpop.f32.mrf.mxu0 }
 0x4f3   : > { %v2162_v51 = vld [vmem:[%s629_s17] ss:$0 sm:$0xff] }
 0x4f4   : > { %v1287_v52 = vpop.f32.mrf.mxu0 }
 0x4f5   : > { %v1291_v53 = vsel %vm737_vm3, %v1287_v52, -inf }
 0x4f6   : > { %1292 = vmax.xlane.f32.xlu1 %v1291_v53  ;;  %v2264_v54 = vpop.f32.mrf.mxu0 }
 0x4f7   : > { %v1819_v54 = vld [vmem:[%s2591_s29 + $0x10] sm:$0xff] }
 0x507   : > { %1455 = vrot.lane.b32.xlu1 %v2640_v9, %s2442_s22 }
 0x50b   : > { %1453 = vrot.lane.b32.xlu1 %v2644_v11, %s2443_s30 }
 0x57f   : > { %v1293_v55 = vpop.xlane.xlu1 %1292 }
 0x580   : > { %v1294_v56 = vsub.f32 %v1287_v52, %v1293_v55  ;;  %v1818_v55 = vld [vmem:[%s2591_s29 + $0x8] sm:$0xff] }
 0x582   : > { %v1295_v57 = vmul.f32 1.442695, %v1294_v56  ;;  %v1817_v56 = vld [vmem:[%s2591_s29] sm:$0xff] }
 0x583   : > { %v1456_v63 = vpop.permute.xlu1 %1455 }
 0x584   : > { %2381 = vpow2.f32 %v1295_v57  ;;  %v2163_v57 = vld [vmem:[%s2845_s26] ss:$0 sm:$0xff] }
 0x587   : > { %v1454_v1 = vpop.permute.xlu1 %1453 }
 0x591   : > { %v2382_v58 = vpop.eup %2381 }
 0x592   : > { %v1297_v59 = vsel %vm737_vm3, %v2382_v58, 0.0 }
 0x593   : > { %1298 = vadd.xlane.f32.xlu0 %v1297_v59 }
 0x5a9   : > { %1302 = vrot.lane.b32.xlu0 %v2640_v9, %s2444_s3  ;;  %s2847_s3 = sld [smem:[#allocation3_spill]] }
 0x5af   : > { %p2169_p8 = scmp.ne.s32.totalorder %s2847_s3, 1 }
 0x61c   : > { %v1299_v60 = vpop.xlane.xlu0 %1298 }
 0x61d   : > { %2383 = vrcp.f32 %v1299_v60 }
 0x620   : > { %v1303_v61 = vpop.permute.xlu0 %1302 }
 0x621   : > { %2266 = vmatpush3.msra.mxu1 %v1303_v61 }
 0x622   : > { %2275 = vmatprep.subr.mxu1 %v2433_v2 }
 0x62a   : > { %v2384_v62 = vpop.eup %2383 }
 0x62b   : > { %v1301_v0 = vmul.f32 %v2384_v62, %v2382_v58  ;;  %v2165_v62 = vld [vmem:[%s2846_s18] ss:$0 sm:$0xff] }
 0x62d   : > { %2268 = vmatmul.mubr.msk.f32.vlgmr.msra.gmra.mxu1 %vm737_vm3, %v1301_v0 }
 0x62e   : > { %2276 = vmatpush3.xpose.msk.msra.mxu1 %vm737_vm3, %v1456_v63  ;;  %2277 = vmatprep.mubr.msk.f32.mxu1 %vm2434_vm1, %v2433_v2 }
 0x62f   : > { %2285 = vmatprep.subr.mxu1 %v2433_v2 }
 0x631   : > { %2278 = vmatmul.mubr.msk.f32.vlgmr.msra.gmra.mxu1 %vm737_vm3, %v1454_v1 }
 0x632   : > { %2287 = vmatprep.mubr.msk.f32.mxu1 %vm2434_vm1, %v2433_v2  ;;  %2286 = vmatpush3.msra.mxu1 %v1618_v17  ;;  %v2168_v17 = vld [vmem:[%s635_s24] ss:$0 sm:$0xff] }
 0x633   : > { %2301 = vmatprep.subr.mxu1 %v2433_v2 }
 0x6ed   : > { %v1374_v4 = vpop.f32.mrf.mxu1 }
 0x6ee   : > { %2273 = vmatmul.mubr.msk.f32.vlgmr.msra.gmra.mxu0 %vm737_vm3, %v1374_v4 }
 0x6ef   : > { %v2269_v5 = vpop.f32.mrf.mxu1  ;;  %2282 = vmatprep.mubr.msk.f32.mxu0 %vm2434_vm1, %v2433_v2 }
 0x6f1   : > { %v1527_v7 = vpop.f32.mrf.mxu1 }
 0x6f2   : > { %v1531_v8 = vsel %vm737_vm3, %v1527_v7, -inf }
 0x6f3   : > { %1532 = vmax.xlane.f32.xlu0 %v1531_v8  ;;  %v2279_v10 = vpop.f32.mrf.mxu1 }
 0x709   : > { %1542 = vrot.lane.b32.xlu0 %v2640_v9, %s2445_s14 }
 0x77c   : > { %v1533_v11 = vpop.xlane.xlu0 %1532 }
 0x77d   : > { %v1534_v12 = vsub.f32 %v1527_v7, %v1533_v11 }
 0x77f   : > { %v1535_v13 = vmul.f32 1.442695, %v1534_v12 }
 0x780   : > { %v1543_v14 = vpop.permute.xlu0 %1542 }
 0x781   : > { %2385 = vpow2.f32 %v1535_v13  ;;  %2281 = vmatpush3.msra.mxu0 %v1543_v14 }
 0x782   : > { %2290 = vmatprep.subr.mxu0 %v2433_v2 }
 0x78e   : > { %v2386_v15 = vpop.eup %2385 }
 0x78f   : > { %v1537_v16 = vsel %vm737_vm3, %v2386_v15, 0.0 }
 0x790   : > { %1538 = vadd.xlane.f32.xlu1 %v1537_v16 }
 0x7ae   : > { %v1448_v18 = vpop.f32.mrf.mxu0 }
 0x7af   : > { %v1452_v19 = vadd.f32 %v1448_v18, %v1210_v50 }
 0x7b0   : > { %v2274_v9 = vpop.f32.mrf.mxu0 }
 0x819   : > { %v1539_v20 = vpop.xlane.xlu1 %1538 }
 0x81a   : > { %2387 = vrcp.f32 %v1539_v20 }
 0x827   : > { %v2388_v21 = vpop.eup %2387 }
 0x828   : > { %v1541_v22 = vmul.f32 %v2388_v21, %v2386_v15  ;;  %v2167_v15 = vld [vmem:[%s632_s1] ss:$0 sm:$0xff] }
 0x82a   : > { %2283 = vmatmul.mubr.msk.f32.vlgmr.msra.gmra.mxu0 %vm737_vm3, %v1541_v22 }
 0x82b   : > { %2298 = vmatprep.mubr.msk.f32.mxu0 %vm2434_vm1, %v2433_v2  ;;  %2291 = vmatpush3.msra.mxu0 %v1735_v37 }
 0x82c   : > { %2292 = vmatprep.subr.mxu0 %v2433_v2 }
 0x82d   : > { %2293 = vmatpush3.msra.mxu0 %v1734_v38 }
 0x82e   : > { %2294 = vmatprep.subr.mxu0 %v2433_v2 }
 0x8ea   : > { %v1614_v23 = vpop.f32.mrf.mxu0 }
 0x8eb   : > { %2288 = vmatmul.mubr.msk.f32.vlgmr.msra.gmra.mxu1 %vm737_vm3, %v1614_v23 }
 0x8ec   : > { %v2284_v24 = vpop.f32.mrf.mxu0  ;;  %2317 = vmatprep.mubr.msk.f32.mxu1 %vm2434_vm1, %v2433_v2  ;;  %2302 = vmatpush3.msra.mxu1 %v1824_v40 }
 0x8ed   : > { %2303 = vmatprep.subr.mxu1 %v2433_v2 }
 0x8ee   : > { %2304 = vmatpush3.msra.mxu1 %v1823_v41 }
 0x8ef   : > { %2305 = vmatprep.subr.mxu1 %v2433_v2 }
 0x8f0   : > { %2306 = vmatpush3.msra.mxu1 %v1822_v42 }
 0x8f1   : > { %2307 = vmatprep.subr.mxu1 %v2433_v2 }
 0x8f2   : > { %2308 = vmatpush3.msra.mxu1 %v1821_v43 }
 0x8f3   : > { %2309 = vmatprep.subr.mxu1 %v2433_v2 }
 0x8f4   : > { %2310 = vmatpush3.msra.mxu1 %v1820_v44 }
 0x8f5   : > { %2311 = vmatprep.subr.mxu1 %v2433_v2 }
 0x8f6   : > { %2312 = vmatpush3.msra.mxu1 %v1819_v54 }
 0x8f7   : > { %2313 = vmatprep.subr.mxu1 %v2433_v2 }
 0x8f8   : > { %2314 = vmatpush3.msra.mxu1 %v1818_v55 }
 0x8f9   : > { %2315 = vmatprep.subr.mxu1 %v2433_v2 }
 0x8fa   : > { %2316 = vmatpush3.msra.mxu1 %v1817_v56 }
 0x9ab   : > { %v1688_v25 = vpop.f32.mrf.mxu1 }
 0x9ac   : > { %v1692_v27 = vadd.f32 %v1688_v25, %v1452_v19 }
 0x9ad   : > { %v2289_v28 = vpop.f32.mrf.mxu1 }
 0x9ae   : > { %v1700_v29 = vadd.f32 %v2160_v26, %v1692_v27 }
 0x9b0   : > { %v1701_v30 = vadd.f32 %v1700_v29, %v2627_v6  ;;  %v1733_v6 = vld [vmem:[%s2577_s13 + $0x8] sm:$0xff] }
 0x9b1   : > { %2295 = vmatpush3.msra.mxu0 %v1733_v6 }
 0x9b2   : > { %v1704_v31 = vsel %vm659_vm2, %v1701_v30, 0.0  ;;  %2296 = vmatprep.subr.mxu0 %v2433_v2 }
 0x9b3   : > { %1705 = vadd.xlane.f32.xlu1 %v1704_v31  ;;  %2297 = vmatpush3.msra.mxu0 %v1732_v39 }
 0xa3c   : > { %v1706_v32 = vpop.xlane.xlu1 %1705 }
 0xa3d   : > { %v1708_v33 = vmul.f32 0.03125, %v1706_v32 }
 0xa3f   : > { %v1709_v34 = vsub.f32 %v1701_v30, %v1708_v33 }
 0xa41   : > { %v1710_v35 = vmul.f32 %v1709_v34, %v1709_v34 }
 0xa43   : > { %v1711_v36 = vsel %vm659_vm2, %v1710_v35, 0.0 }
 0xa44   : > { %1712 = vadd.xlane.f32.xlu1 %v1711_v36 }
 0xacd   : > { %v1713_v45 = vpop.xlane.xlu1 %1712 }
 0xace   : > { %v1714_v46 = vmul.f32 0.03125, %v1713_v45 }
 0xad0   : > { %v1715_v47 = vadd.f32 1e-05, %v1714_v46 }
 0xad2   : > { %2389 = vrsqrt.f32 %v1715_v47 }
 0xadf   : > { %v2390_v48 = vpop.eup %2389 }
 0xae0   : > { %v1717_v50 = vmul.f32 %v2390_v48, %v1709_v34 }
 0xae2   : > { %v1724_v52 = vmul.f32 %v2161_v49, %v1717_v50 }
 0xae4   : > { %v1731_v53 = vadd.f32 %v2162_v51, %v1724_v52 }
 0xae6   : > { %2299 = vmatmul.mubr.msk.f32.vlgmr.msra.gmra.mxu0 %vm659_vm2, %v1731_v53 }
 0xba6   : > { %v1812_v58 = vpop.f32.mrf.mxu0 }
 0xba7   : > { %v1813_v59 = vadd.f32 %v2163_v57, %v1812_v58 }
 0xba8   : > { %v2300_v60 = vpop.f32.mrf.mxu0 }
 0xba9   : > { %v1816_v61 = vmax.f32 %v1813_v59, 0.0 }
 0xbab   : > { %2318 = vmatmul.mubr.msk.f32.vlgmr.msra.gmra.mxu1 %vm1832_vm4, %v1816_v61 }
 0xc6b   : > { %v1902_v63 = vpop.f32.mrf.mxu1 }
 0xc6c   : > { %v1903_v0 = vadd.f32 %v2165_v62, %v1902_v63 }
 0xc6d   : > { %v2319_v2 = vpop.f32.mrf.mxu1 }
 0xc6e   : > { %v1906_v1 = vadd.f32 %v1903_v0, %v1731_v53 }
 0xc70   : > { %v1909_v3 = vsel %vm659_vm2, %v1906_v1, 0.0 }
 0xc71   : > { %1910 = vadd.xlane.f32.xlu1 %v1909_v3 }
 0xcfa   : > { %v1911_v4 = vpop.xlane.xlu1 %1910 }
 0xcfb   : > { %v1912_v5 = vmul.f32 0.03125, %v1911_v4 }
 0xcfd   : > { %v1913_v7 = vsub.f32 %v1906_v1, %v1912_v5 }
 0xcff   : > { %v1914_v8 = vmul.f32 %v1913_v7, %v1913_v7 }
 0xd01   : > { %v1915_v10 = vsel %vm659_vm2, %v1914_v8, 0.0 }
 0xd02   : > { %1916 = vadd.xlane.f32.xlu1 %v1915_v10 }
 0xd8b   : > { %v1917_v11 = vpop.xlane.xlu1 %1916 }
 0xd8c   : > { %v1918_v12 = vmul.f32 0.03125, %v1917_v11 }
 0xd8e   : > { %v1919_v13 = vadd.f32 1e-05, %v1918_v12 }
 0xd90   : > { %2391 = vrsqrt.f32 %v1919_v13 }
 0xd9d   : > { %v2392_v14 = vpop.eup %2391 }
 0xd9e   : > { %v1921_v16 = vmul.f32 %v2392_v14, %v1913_v7 }
 0xda0   : > { %v1928_v18 = vmul.f32 %v2167_v15, %v1921_v16  ;;  %1940 = sbr.rel (%p2169_p8) target bundleno = 3494 (0xda6), region = 80 }
 0xda2   : > { %v1935_v19 = vadd.f32 %v2168_v17, %v1928_v18 }
 0xda4   : > { %1936 = vst.msk [vmem:[#allocation2] sm:$0xff] %vm659_vm2, %v1935_v19 }
 0xda5   : > { %1941 = vst.msk [vmem:[%s2612_s28] sm:$0xff] %vm659_vm2, %v1935_v19 }
 0xda6 PF: > { %s2848_s14 = sld [smem:[#allocation6_spill]] }
 0xda7   : > { %s2849_s25 = sld [smem:[#allocation4_spill]] }
 0xda8   : > { %s2850_s26 = sld [smem:[#allocation5_spill]] }
 0xda9   : > { %s2851_s27 = sld [smem:[#allocation7_spill]] }
 0xdaa   : > { %s2852_s28 = sld [smem:[#allocation8_spill]] }
 0xdac   : > { %s23_s29 = sadd.s32 1, %s2848_s14  }
 0xdad   : > { %p20_p9 = scmp.ge.s32.totalorder %s23_s29, 6  }
 0xdaf   :  { %22 = sbr.rel (!%p20_p9) target bundleno = 7 (0x7), region = 146 }

</bundles_post_ra>
